<compile_context>
chip_gen: v6e
topology: v6e:2x2x1
jax: 0.10.0
libtpu: 0.0.40
codegen_flags: <defaults>
</compile_context>

<pallas_src>
import jax
import jax.numpy as jnp
from jax.experimental import pallas as pl
from jax.experimental.pallas import tpu as pltpu

ACT_DTYPE = jnp.bfloat16   # activation streaming dtype
# VMEM bytes per int8 weight element in a tile:
#   2x int8 (double-buffered HBM stream) + 2x (bf16 dequant temporary)
WEIGHT_VMEM_PER_ELEM = 4


# ---------------------------------------------------------------------------
# Tiling helpers
# ---------------------------------------------------------------------------
def _vmem_capacity_bytes():
    """Physical VMEM per TensorCore; conservative fallback if query fails."""
    try:
        return int(pltpu.get_tpu_info().vmem_capacity_bytes)
    except Exception:  # pragma: no cover - emulator / older jax
        return 64 * 1024 * 1024   # v7x-sized, the smallest of the fleet


def _largest_tile(dim, cap, align=128):
    """Largest t <= cap with dim % t == 0 and t a multiple of `align`
    (or the whole dim if dim <= cap / no aligned divisor exists)."""
    if dim <= cap:
        return dim
    t = (cap // align) * align
    while t >= align:
        if dim % t == 0:
            return t
        t -= align
    return dim   # caller guards VMEM fit explicitly


# ---------------------------------------------------------------------------
# Kernel 1a (fast path): y = relu((x @ dequant(Wq)) * scale + shift),
# whole K in one weight block.  Grid = (N/tn,); x block constant -> resident.
# ---------------------------------------------------------------------------
def _qlinear_bn_relu_fast_kernel(x_ref, wq_ref, scale_ref, shift_ref, o_ref):
    w = wq_ref[...].astype(jnp.bfloat16)           # |q| <= 127 -> exact in bf16
    y = jnp.dot(x_ref[...], w, preferred_element_type=jnp.float32)
    y = y * scale_ref[...] + shift_ref[...]
    o_ref[...] = jnp.maximum(y, 0.0).astype(o_ref.dtype)


# ---------------------------------------------------------------------------
# Kernel 1b (general path): K-last reduction grid with f32 VMEM accumulator.
# Grid = (N/tn, K/tk).
# ---------------------------------------------------------------------------
def _qlinear_bn_relu_acc_kernel(x_ref, wq_ref, scale_ref, shift_ref, o_ref,
                                acc_ref):
    k = pl.program_id(1)

    @pl.when(k == 0)
    def _():
        acc_ref[...] = jnp.zeros_like(acc_ref)

    acc_ref[...] += jnp.dot(
        x_ref[...], wq_ref[...].astype(jnp.bfloat16),
        preferred_element_type=jnp.float32)

    @pl.when(k == pl.num_programs(1) - 1)
    def _():
        y = acc_ref[...] * scale_ref[...] + shift_ref[...]
        o_ref[...] = jnp.maximum(y, 0.0).astype(o_ref.dtype)


def quantized_linear_bn_relu(x, w_q, qscale, shift, *, weight_vmem_budget=None):
    """Fused linear (int8 weight-only quant) + folded-BN + ReLU.
    x:(M,K) bf16, w_q:(K,N) int8, qscale/shift:(N,) f32.  Returns (M,N) bf16."""
    M, K = x.shape
    Kw, N = w_q.shape
    assert Kw == K and M % 8 == 0 and w_q.dtype == jnp.int8

    vmem_phys = _vmem_capacity_bytes()
    if weight_vmem_budget is None:
        # ~75% of physical VMEM for the weight pipeline; at batch<=16 the x /
        # output / accumulator / scale buffers are < 1 MiB combined.
        weight_vmem_budget = (vmem_phys * 3) // 4

    x_bytes = jnp.dtype(x.dtype).itemsize
    o_bytes = jnp.dtype(ACT_DTYPE).itemsize

    def tile_cost(tk_, tn_):
        return WEIGHT_VMEM_PER_ELEM * tk_ * tn_

    tm = M
    # N tile: cap at 2048, and keep >= 2 N tiles when N allows so the leading
    # "parallel" axis can be split across v7x's two TensorCores.
    tn_cap = min(N, 2048)
    if N >= 256:
        tn_cap = min(tn_cap, max(128, N // 2))
    tn = _largest_tile(N, tn_cap)

    # Fast path: whole K in one weight block.  Shrink tn (down to 128) first so
    # the big layers stay on the no-reduction path on every generation.
    tn_fast = None
    if tile_cost(K, tn) <= weight_vmem_budget:
        tn_fast = tn
    else:
        t = (tn // 128) * 128
        while t >= 128:
            if N % t == 0 and tile_cost(K, t) <= weight_vmem_budget:
                tn_fast = t
                break
            t -= 128

    scale2d = qscale.reshape(1, N).astype(jnp.float32)
    shift2d = shift.reshape(1, N).astype(jnp.float32)

    if tn_fast is not None:
        # ---- fast path: no reduction grid axis, no accumulator ----
        tn = tn_fast
        tk = K
        grid = (N // tn,)
        in_specs = [
            pl.BlockSpec((tm, K), lambda j: (0, 0)),
            pl.BlockSpec((K, tn), lambda j: (0, j)),
            pl.BlockSpec((1, tn), lambda j: (0, j)),
            pl.BlockSpec((1, tn), lambda j: (0, j)),
        ]
        out_specs = pl.BlockSpec((tm, tn), lambda j: (0, j))
        scratch = []
        kernel = _qlinear_bn_relu_fast_kernel
        dim_sem = ("parallel",)
    else:
        # ---- general path: tiled K reduction (K-last) with accumulator ----
        tk = _largest_tile(
            K, max(128, weight_vmem_budget // (WEIGHT_VMEM_PER_ELEM * tn)))
        grid = (N // tn, K // tk)
        in_specs = [
            pl.BlockSpec((tm, tk), lambda j, k: (0, k)),
            pl.BlockSpec((tk, tn), lambda j, k: (k, j)),
            pl.BlockSpec((1, tn), lambda j, k: (0, j)),
            pl.BlockSpec((1, tn), lambda j, k: (0, j)),
        ]
        out_specs = pl.BlockSpec((tm, tn), lambda j, k: (0, j))
        scratch = [pltpu.VMEM((tm, tn), jnp.float32)]
        kernel = _qlinear_bn_relu_acc_kernel
        dim_sem = ("parallel", "arbitrary")

    vmem_need = (tile_cost(tk, tn)              # int8 stream + bf16 dequant temp
                 + 2 * tm * tk * x_bytes        # x pipeline buffers
                 + 2 * tm * tn * o_bytes        # output pipeline buffers
                 + 4 * tn * 4                   # scale + shift (double-buffered)
                 + tm * tn * 4)                 # f32 accumulator (acc path)
    assert vmem_need <= vmem_phys, (
        "chosen tiles exceed physical VMEM; pad K/N to multiples of 128")
    vmem_limit = int(min(max(vmem_need + (8 << 20), 32 << 20),
                         vmem_phys * 92 // 100))

    return pl.pallas_call(
        kernel,
        out_shape=jax.ShapeDtypeStruct((M, N), ACT_DTYPE),
        grid_spec=pltpu.PrefetchScalarGridSpec(
            num_scalar_prefetch=0,
            grid=grid,
            in_specs=in_specs,
            out_specs=out_specs,
            scratch_shapes=scratch,
        ),
        compiler_params=pltpu.CompilerParams(
            dimension_semantics=dim_sem,
            vmem_limit_bytes=vmem_limit,
        ),
    )(x, w_q, scale2d, shift2d)


# ---------------------------------------------------------------------------
# Kernel 2: fused tail  fc3+bn3+relu -> fc4+bn4+relu -> fc5+bn5+relu
#           -> log_softmax.  All three (quantized) weights live in VMEM.
# Per-layer (scale, shift) are packed into a single (2, N) f32 array each.
# ---------------------------------------------------------------------------
def _fused_tail_kernel(x_ref, w3_ref, p3_ref, w4_ref, p4_ref, w5_ref, p5_ref,
                       o_ref):
    def qmm_bn_relu(h, w_ref, p_ref):
        y = jnp.dot(h, w_ref[...].astype(jnp.bfloat16),
                    preferred_element_type=jnp.float32)
        p = p_ref[...]
        return jnp.maximum(y * p[0:1, :] + p[1:2, :], 0.0)

    h = qmm_bn_relu(x_ref[...], w3_ref, p3_ref).astype(jnp.bfloat16)
    h = qmm_bn_relu(h, w4_ref, p4_ref).astype(jnp.bfloat16)
    z = qmm_bn_relu(h, w5_ref, p5_ref)
    m = jnp.max(z, axis=-1, keepdims=True)
    lse = jnp.log(jnp.sum(jnp.exp(z - m), axis=-1, keepdims=True)) + m
    o_ref[...] = (z - lse).astype(o_ref.dtype)


def fused_tail(x, params3, params4, params5):
    (w3, sc3, sh3) = params3
    (w4, sc4, sh4) = params4
    (w5, sc5, sh5) = params5
    M, K3 = x.shape
    N3, N4, N5 = w3.shape[1], w4.shape[1], w5.shape[1]
    assert M % 8 == 0
    assert w3.shape[0] == K3 and w4.shape[0] == N3 and w5.shape[0] == N4
    tm = M   # batch is tiny; splitting it across cores would duplicate the
             # (HBM-bound) tail weight DMA per core, so keep grid=(1,).

    def _pack(sc, sh):
        return jnp.stack([sc, sh], axis=0).astype(jnp.float32)   # (2, N)

    vmem_phys = _vmem_capacity_bytes()
    w_elems = K3 * N3 + N3 * N4 + N4 * max(N5, 128)
    vmem_need = (WEIGHT_VMEM_PER_ELEM * w_elems      # int8 x2 + bf16 temps
                 + 4 * tm * K3                       # x pipeline (bf16 x2)
                 + 8 * tm * max(N3, N4)              # intermediates headroom
                 + 4 * tm * max(N5, 128)             # output
                 + (1 << 20))
    assert vmem_need <= vmem_phys, "fused tail weights do not fit in VMEM"
    vmem_limit = int(min(max(vmem_need + (8 << 20), 32 << 20),
                         vmem_phys * 92 // 100))

    return pl.pallas_call(
        _fused_tail_kernel,
        out_shape=jax.ShapeDtypeStruct((M, N5), jnp.float32),
        grid_spec=pltpu.PrefetchScalarGridSpec(
            num_scalar_prefetch=0,
            grid=(1,),
            in_specs=[
                pl.BlockSpec((tm, K3), lambda i: (0, 0)),
                pl.BlockSpec((K3, N3), lambda i: (0, 0)),
                pl.BlockSpec((2, N3), lambda i: (0, 0)),
                pl.BlockSpec((N3, N4), lambda i: (0, 0)),
                pl.BlockSpec((2, N4), lambda i: (0, 0)),
                pl.BlockSpec((N4, N5), lambda i: (0, 0)),
                pl.BlockSpec((2, N5), lambda i: (0, 0)),
            ],
            out_specs=pl.BlockSpec((tm, N5), lambda i: (0, 0)),
        ),
        compiler_params=pltpu.CompilerParams(
            dimension_semantics=("arbitrary",),
            vmem_limit_bytes=vmem_limit,
        ),
    )(x, w3, _pack(sc3, sh3), w4, _pack(sc4, sh4), w5, _pack(sc5, sh5))


# ---------------------------------------------------------------------------
# Parameter construction: PyTorch-default-style Linear init + default
# BatchNorm1d (eval) stats, BN folded and weights quantized to int8 with a
# per-output-channel scale.
# ---------------------------------------------------------------------------
def make_layer_params(key, d_in, d_out, eps=1e-5):
    kw, kb = jax.random.split(key)
    bound = float(1.0 / (d_in ** 0.5))
    w = jax.random.uniform(kw, (d_in, d_out), jnp.float32, -bound, bound)
    b = jax.random.uniform(kb, (d_out,), jnp.float32, -bound, bound)
    # BatchNorm1d defaults: gamma=1, beta=0, running_mean=0, running_var=1
    gamma = jnp.ones((d_out,), jnp.float32)
    beta = jnp.zeros((d_out,), jnp.float32)
    run_mean = jnp.zeros((d_out,), jnp.float32)
    run_var = jnp.ones((d_out,), jnp.float32)
    bn_scale = gamma / jnp.sqrt(run_var + eps)
    shift = beta - run_mean * bn_scale + b * bn_scale
    w_folded = w * bn_scale[None, :]                      # fold BN scale into W
    # per-output-channel symmetric int8 quantization
    amax = jnp.maximum(jnp.max(jnp.abs(w_folded), axis=0), 1e-12)
    qscale = (amax / 127.0).astype(jnp.float32)
    w_q = jnp.clip(jnp.round(w_folded / qscale[None, :]),
                   -127.0, 127.0).astype(jnp.int8)
    return w_q, qscale, shift.astype(jnp.float32)


def usual_net_forward(x, params):
    """params: list of 5 (w_q int8, qscale, shift). Dropout = identity (eval)."""
    B = x.shape[0]
    Bp = ((B + 15) // 16) * 16          # bf16 packs 16 rows per vreg sublane set
    h = x.astype(ACT_DTYPE)
    if Bp != B:
        h = jnp.pad(h, ((0, Bp - B), (0, 0)))
    for p in params[:2]:                        # fc1+bn1+relu, fc2+bn2+relu
        h = quantized_linear_bn_relu(h, *p)
    out = fused_tail(h, params[2], params[3], params[4])   # fc3..fc5 fused
    return out[:B]


# ---------------------------------------------------------------------------
# Pure-JAX reference (same int8-dequant / bf16 / f32 numerics)
# ---------------------------------------------------------------------------
def reference_forward(x, params):
    h = x.astype(ACT_DTYPE)
    z = None
    for i, (wq, qs, sh) in enumerate(params):
        y = jnp.dot(h, wq.astype(jnp.bfloat16),
                    preferred_element_type=jnp.float32)
        y = jnp.maximum(y * qs + sh, 0.0)
        if i < len(params) - 1:
            h = y.astype(ACT_DTYPE)
        else:
            z = y
    return jax.nn.log_softmax(z, axis=-1)


if __name__ == "__main__":
    # Scaled-down shapes (original: 3072 -> 32768 -> 8192 -> 1024 -> 1024 -> 10)
    B = 8
    dims = [384, 512, 256, 256, 128, 10]

    root = jax.random.PRNGKey(0)
    keys = jax.random.split(root, len(dims))   # keys[0] input, rest per layer

    params = [
        make_layer_params(keys[i + 1], dims[i], dims[i + 1])
        for i in range(len(dims) - 1)
    ]

    # layout: x is (batch, features) = flattened NCHW CIFAR image per sample
    x = jax.random.normal(keys[0], (B, dims[0]), jnp.float32)

    out = usual_net_forward(x, params)
    out = jax.block_until_ready(out)

    assert out.shape == (B, dims[-1])
    # log_softmax rows must sum to 1 in probability space
    assert jnp.allclose(jnp.sum(jnp.exp(out), axis=-1), 1.0, atol=1e-4)
    # full-network check against the pure-JAX reference
    ref = reference_forward(x, params)
    assert jnp.allclose(out, ref, atol=3e-2, rtol=3e-2), float(
        jnp.max(jnp.abs(out - ref)))

    # Also exercise the tiled-K accumulator path (only used when even a
    # (K, 128) slab would not fit) by shrinking the weight VMEM budget.
    w0q, qs0, sh0 = params[0]
    h16 = jnp.pad(x.astype(ACT_DTYPE), ((0, 16 - B), (0, 0)))
    y_acc = quantized_linear_bn_relu(h16, w0q, qs0, sh0,
                                     weight_vmem_budget=64 * 1024)
    y_ref = jnp.maximum(
        jnp.dot(h16, w0q.astype(jnp.bfloat16),
                preferred_element_type=jnp.float32) * qs0 + sh0, 0.0
    ).astype(ACT_DTYPE)
    y_acc = jax.block_until_ready(y_acc)
    assert jnp.allclose(y_acc.astype(jnp.float32), y_ref.astype(jnp.float32),
                        atol=3e-2, rtol=3e-2)

    print("KERNEL_OK")
</pallas_src>

<mosaic_0001>
module attributes {stable_mosaic.version = 11 : i64} {
  func.func @_qlinear_bn_relu_fast_kernel(%arg0: i32, %arg1: memref<16x384xbf16, #tpu.memory_space<vmem>>, %arg2: memref<384x256xi8, #tpu.memory_space<vmem>>, %arg3: memref<1x256xf32, #tpu.memory_space<vmem>>, %arg4: memref<1x256xf32, #tpu.memory_space<vmem>>, %arg5: memref<16x256xbf16, #tpu.memory_space<vmem>>) attributes {dimension_semantics = [#tpu.dimension_semantics<parallel>], iteration_bounds = array<i64: 2>, scalar_prefetch = 0 : i64, scratch_operands = 0 : i64, tpu.core_type = #tpu.core_type<tc>, window_params = [{pipeline_mode = #tpu.pipeline_mode<synchronous>, transform_indices = @transform_0, window_bounds = array<i64: 16, 384>}, {transform_indices = @transform_1, window_bounds = array<i64: 384, 256>}, {transform_indices = @transform_2, window_bounds = array<i64: 1, 256>}, {transform_indices = @transform_3, window_bounds = array<i64: 1, 256>}, {transform_indices = @transform_4, window_bounds = array<i64: 16, 256>}]} {
    %c0 = arith.constant 0 : index
    %c0_0 = arith.constant 0 : index
    %0 = vector.load %arg2[%c0, %c0_0] : memref<384x256xi8, #tpu.memory_space<vmem>>, vector<384x256xi8>
    %1 = arith.sitofp %0 : vector<384x256xi8> to vector<384x256xbf16>
    %c0_1 = arith.constant 0 : index
    %c0_2 = arith.constant 0 : index
    %2 = vector.load %arg1[%c0_1, %c0_2] : memref<16x384xbf16, #tpu.memory_space<vmem>>, vector<16x384xbf16>
    %cst = arith.constant dense<0.000000e+00> : vector<16x256xf32>
    %3 = tpu.matmul %2, %1, %cst {dimension_numbers = #tpu.dot_dimension_numbers<[1], [0], [0], [1], [0, 0, 1, 1], [], []>} : vector<16x384xbf16>, vector<384x256xbf16>, vector<16x256xf32> -> vector<16x256xf32>
    %c0_3 = arith.constant 0 : index
    %c0_4 = arith.constant 0 : index
    %4 = vector.load %arg3[%c0_3, %c0_4] : memref<1x256xf32, #tpu.memory_space<vmem>>, vector<1x256xf32>
    %5 = vector.broadcast %4 : vector<1x256xf32> to vector<16x256xf32>
    %6 = arith.mulf %3, %5 : vector<16x256xf32>
    %c0_5 = arith.constant 0 : index
    %c0_6 = arith.constant 0 : index
    %7 = vector.load %arg4[%c0_5, %c0_6] : memref<1x256xf32, #tpu.memory_space<vmem>>, vector<1x256xf32>
    %8 = vector.broadcast %7 : vector<1x256xf32> to vector<16x256xf32>
    %9 = arith.addf %6, %8 : vector<16x256xf32>
    %cst_7 = arith.constant 0.000000e+00 : f32
    %10 = vector.broadcast %cst_7 : f32 to vector<16x256xf32>
    %11 = arith.maximumf %9, %10 : vector<16x256xf32>
    %12 = arith.truncf %11 : vector<16x256xf32> to vector<16x256xbf16>
    %c0_8 = arith.constant 0 : index
    %c0_9 = arith.constant 0 : index
    %13 = vector.load %arg5[%c0_8, %c0_9] : memref<16x256xbf16, #tpu.memory_space<vmem>>, vector<16x256xbf16>
    tpu.vector_store %arg5[%c0_8, %c0_9], %12 {strides = array<i32>} : memref<16x256xbf16, #tpu.memory_space<vmem>>, vector<16x256xbf16>,
    return
  }
  func.func @transform_0(%arg0: i32) -> (i32, i32) {
    %c0_i32 = arith.constant 0 : i32
    %c0_i32_0 = arith.constant 0 : i32
    %c0_i32_1 = arith.constant 0 : i32
    return %c0_i32, %c0_i32_0 : i32, i32
  }
  func.func @transform_1(%arg0: i32) -> (i32, i32) {
    %c0_i32 = arith.constant 0 : i32
    %c0_i32_0 = arith.constant 0 : i32
    return %c0_i32, %arg0 : i32, i32
  }
  func.func @transform_2(%arg0: i32) -> (i32, i32) {
    %c0_i32 = arith.constant 0 : i32
    %c0_i32_0 = arith.constant 0 : i32
    return %c0_i32, %arg0 : i32, i32
  }
  func.func @transform_3(%arg0: i32) -> (i32, i32) {
    %c0_i32 = arith.constant 0 : i32
    %c0_i32_0 = arith.constant 0 : i32
    return %c0_i32, %arg0 : i32, i32
  }
  func.func @transform_4(%arg0: i32) -> (i32, i32) {
    %c0_i32 = arith.constant 0 : i32
    %c0_i32_0 = arith.constant 0 : i32
    return %c0_i32, %arg0 : i32, i32
  }
}

</mosaic_0001>

<bundles_post_ra>
// kernel: tpu_custom_call.1
= control target key start
LH: loop header
LB: loop body
LE: loop exit
PB: predicated region body
PF: predicated region fallthrough
CT: control target
= control target key end

     0   :  { %s1196_s0 = inlined_call_operand.hbm [shape: bf16[16,384], index: 0, kind: input, shape index: {}]   ;;  %s1197_s1 = inlined_call_operand.hbm [shape: s8[384,512], index: 1, kind: input, shape index: {}]   ;;  %s1198_s2 = inlined_call_operand.hbm [shape: f32[1,512], index: 2, kind: input, shape index: {}]   ;;  %s1199_s3 = inlined_call_operand.vmem [shape: f32[1,512], index: 3, kind: input, shape index: {}]   ;;  %s1200_s4 = inlined_call_operand.hbm [shape: bf16[16,512], index: 4, kind: output, shape index: {}]  }
   0x1   :  { %1205 = sst [smem:[#allocation12_spill]] %s1197_s1 }
   0x2   :  { %9 = vsyncpa [#allocation3], 0 }
   0x3   :  { %10 = vsyncpa [#allocation6], 0 }
   0x4   :  { %12 = vsyncpa [#allocation6 + $0x1], 0 }
   0x5   :  { %13 = vsyncpa [#allocation4], 0 }
   0x6   :  { %15 = vsyncpa [#allocation4 + $0x1], 0  ;;  %s941_s15 = smov 0   ;;  %s943_s16 = smov 0  }
   0x7   :  { %s945_s17 = smov 0   ;;  %s947_s18 = smov 0  }
   0x8 LB: > { %s962_s19 = sadd.s32 1, %s901_s18   ;;  %s49_s20 = sadd.s32 1, %s897_s17  ;;  %s901_s18 = sphi %s947_s18, %s1224_s18   ;;  %s897_s17 = sphi %s945_s17, %s1223_s17   ;;  %s893_s16 = sphi %s943_s16, %s1222_s16   ;;  %s889_s15 = sphi %s941_s15, %s1221_s15  }
   0x9   : > { %s46_s21 = ssub.s32 %s901_s18, %s962_s19  ;;  %p56_p0 = scmp.ne.s32.totalorder %s897_s17, %s893_s16 }
   0xa   : > { %p47_p1 = scmp.eq.s32.totalorder %s46_s21, 0  ;;  %p57_p2 = scmp.eq.s32.totalorder %s901_s18, 0 }
   0xb   : > { %p702_p4 = scmp.lt.s32.totalorder %s901_s18, 2  ;;  %s177_s23 = sand.u32 1, %s901_s18  }
   0xc   : > { %s973_s22 = scalar_select %p47_p1, %s897_s17, %s49_s20  }
   0xd   : > { %p58_p5 = por %p57_p2, %p56_p0  ;;  %s179_s24 = sand.u32 1, %s897_s17  }
   0xe   : > { %s674_s25 = smul.u32 192, %s179_s24  ;;  %s669_s26 = sshll.u32 %s901_s18, 8 }
   0xf   : > { %s1206_s1 = sld [smem:[#allocation12_spill]]  ;;  %p988_p6 = pnand %p702_p4, %p58_p5 }
  0x10   : > { %s181_s5 = scalar_lea.vmem [#allocation5], %s674_s25  ;;  %s994_s7 = scalar_lea.sflag [#allocation6], %s177_s23 }
  0x11   : > { %s188_s6 = sshll.u32 %s181_s5, 4  ;;  %p1202_p8 = pneg %p988_p6  ;;  %s992_s6 = int_to_ptr.vmem [resolvable:$true] %s188_s6 }
  0x15   : > { %s986_s29 = scalar_lea.hbm %s1206_s1, %s669_s26  ;;  %s756_s11 = scalar_lea.hbm %s1206_s1, 6144 }
  0x16   : > { %s751_s8 = scalar_lea.hbm %s986_s29, 3072  ;;  %p757_p11 = scmp.lt.s32.totalorder %s986_s29, %s1206_s1 }
  0x17   : > { %p752_p7 = scmp.ne.s32.totalorder %s986_s29, %s751_s8  ;;  %p758_p12 = scmp.lt.s32.totalorder %s756_s11, %s751_s8 }
  0x19   : > { %p754_p9 = pnand %p1202_p8, %p752_p7  ;;  %p759_p13 = por %p758_p12, %p757_p11 }
  0x1b   : > { %p755_p10 = pneg %p754_p9 }
  0x1d   : > { %p760_p1 = pnand %p759_p13, %p755_p10 }
  0x1f   : > { %763 = shalt.err (!%p760_p1)
}
  0x20   : > { %s764_s14 = scalar_lea.vmem %s992_s6, 3072  ;;  %s903_s20 = smov [#allocation5]  }
  0x21   : > { %p765_p2 = scmp.ne.s32.totalorder %s992_s6, %s764_s14  ;;  %s769_s21 = sshll.u32 %s903_s20, 4  ;;  %s770_s21 = int_to_ptr.vmem [resolvable:$false] %s769_s21 }
  0x22   : > { %s771_s23 = scalar_lea.vmem %s770_s21, 6144  ;;  %p772_p7 = scmp.lt.s32.totalorder %s992_s6, %s770_s21 }
  0x23   : > { %p767_p4 = pnand %p765_p2, %p1202_p8  ;;  %p773_p9 = scmp.lt.s32.totalorder %s771_s23, %s764_s14 }
  0x25   : > { %p768_p5 = pneg %p767_p4  ;;  %p774_p3 = por %p773_p9, %p772_p7 }
  0x27   : > { %p775_p11 = pnand %p774_p3, %p768_p5 }
  0x29   : > { %778 = shalt.err (!%p775_p11)
}
  0x2a   : > { %s904_s25 = smov 512   ;;  %s905_s26 = smov 256  }
  0x2b   : > { %s906_s27 = smov 16   ;;  %s1022_s28 = sadd.s32 4294967295, %s901_s18  }
  0x2c   : > { %693 = dma.hbm_to_vmem [thread:$0]  (!%p988_p6), %s986_s29, 3072, %s992_s6, %s994_s7, %s904_s25, %s905_s26, %s906_s27  }
  0x2d   : > { %s645_s5 = sadd.s32 4294967294, %s901_s18   ;;  %p62_p3 = scmp.ne.s32.totalorder %s893_s16, %s889_s15 }
  0x2e   : > { %p1201_p10 = scmp.eq.s32.totalorder %s1022_s28, 0  ;;  %p138_p12 = scmp.eq.s32.totalorder %s1022_s28, 1 }
  0x2f   : > { %p144_p13 = scmp.eq.s32.totalorder %s645_s5, 1  ;;  %p646_p1 = scmp.ge.s32.totalorder %s901_s18, 1 }
  0x30   : > { %p1032_p2 = por %p1201_p10, %p62_p3  ;;  %p1039_p4 = por %p138_p12, %p56_p0 }
  0x31   : > { %p1043_p5 = por %p144_p13, %p62_p3  ;;  %p151_p7 = scmp.lt.s32.totalorder %s901_s18, 3 }
  0x32   : > { %s1208_s8 = scalar_select %p1032_p2, 1, 0 }
  0x33   : > { %s1209_s29 = scalar_select %p1039_p4, 1, 0 }
  0x34   : > { %s1210_s6 = scalar_select %p1043_p5, 1, 0 }
  0x35   : > { %p1048_p9 = pnand %p646_p1, %p151_p7  ;;  %s907_s10 = smov [#allocation2]  }
  0x36   : > { %s163_s11 = sshll.u32 %s907_s10, 4  ;;  %s651_s12 = sshll.u32 %s179_s24, 1  ;;  %s164_s11 = int_to_ptr.vmem [resolvable:$true] %s163_s11 }
  0x37   : > { %p686_p11 = pneg %p1048_p9  ;;  %s670_s13 = sshll.u32 %s901_s18, 5 }
  0x38   : > { %s1066_s23 = scalar_lea.hbm %s1198_s2, %s670_s13  ;;  %s202_s25 = scalar_lea.vmem [#allocation7], %s651_s12 }
  0x39   : > { %p1059_p0 = pnand %p686_p11, %p1201_p10  ;;  %s210_s26 = sshll.u32 %s202_s25, 4  ;;  %s1068_s26 = int_to_ptr.vmem [resolvable:$true] %s210_s26 }
  0x3a   : > { %s790_s27 = scalar_lea.vmem %s164_s11, 384  ;;  %p798_p7 = scmp.lt.s32.totalorder %s164_s11, %s164_s11 }
  0x3b   : > { %p781_p3 = pneg %p1059_p0  ;;  %p791_p12 = scmp.ne.s32.totalorder %s164_s11, %s790_s27 }
  0x3c   : > { %p799_p11 = scmp.lt.s32.totalorder %s790_s27, %s790_s27 }
  0x3d   : > { %p793_p13 = pnand %p791_p12, %p781_p3 }
  0x3e   : > { %p800_p10 = por %p799_p11, %p798_p7 }
  0x3f   : > { %p794_p1 = pneg %p793_p13 }
  0x41   : > { %p801_p8 = pnand %p800_p10, %p794_p1 }
  0x43   : > { %804 = shalt.err (!%p801_p8)
}
  0x44   : > { %s908_s24 = smov 192   ;;  %s909_s5 = smov 12  }
  0x45   : > { %689 = dma.hbm_to_vmem [thread:$0]  (!%p1059_p0), %s1196_s0, 384, %s164_s11, [#allocation3], %s908_s24, %s908_s24, %s909_s5  }
  0x46   : > { %s805_s13 = scalar_lea.hbm %s1066_s23, 32  ;;  %p1213_p12 = pneg %p988_p6 }
  0x47   : > { %p806_p3 = scmp.ne.s32.totalorder %s1066_s23, %s805_s13  ;;  %s810_s25 = scalar_lea.hbm %s1198_s2, 64 }
  0x48   : > { %p811_p8 = scmp.lt.s32.totalorder %s1066_s23, %s1198_s2  ;;  %p812_p10 = scmp.lt.s32.totalorder %s810_s25, %s805_s13 }
  0x49   : > { %p808_p13 = pnand %p806_p3, %p1213_p12 }
  0x4a   : > { %p813_p1 = por %p812_p10, %p811_p8 }
  0x4b   : > { %p809_p7 = pneg %p808_p13 }
  0x4d   : > { %p814_p11 = pnand %p813_p1, %p809_p7 }
  0x4f   : > { %817 = shalt.err (!%p814_p11)
}
  0x50   : > { %s818_s11 = scalar_lea.vmem %s1068_s26, 32  ;;  %p1214_p3 = pmov %p1213_p12 }
  0x51   : > { %p819_p0 = scmp.ne.s32.totalorder %s1068_s26, %s818_s11  ;;  %s910_s14 = smov [#allocation7]  }
  0x52   : > { %s823_s24 = sshll.u32 %s910_s14, 4  ;;  %s824_s24 = int_to_ptr.vmem [resolvable:$false] %s823_s24 }
  0x53   : > { %p821_p12 = pnand %p819_p0, %p1214_p3  ;;  %s825_s5 = scalar_lea.vmem %s824_s24, 64 }
  0x54   : > { %p826_p5 = scmp.lt.s32.totalorder %s1068_s26, %s824_s24  ;;  %p827_p4 = scmp.lt.s32.totalorder %s825_s5, %s818_s11 }
  0x55   : > { %p822_p13 = pneg %p821_p12 }
  0x56   : > { %p828_p2 = por %p827_p4, %p826_p5 }
  0x58   : > { %p829_p8 = pnand %p828_p2, %p822_p13 }
  0x5a   : > { %832 = shalt.err (!%p829_p8)
}
  0x5b   : > { %696 = dma.hbm_to_vmem [thread:$0]  (!%p988_p6), %s1066_s23, 32, %s1068_s26, %s994_s7  }
  0x5c   : > { %227 = sbr.rel (%p1048_p9) target bundleno = 394 (0x18a), region = 36  ;;  %p1215_p7 = scmp.eq.s32.totalorder (!%p1048_p9), %s1022_s28, 0 }
  0x61   : > { %876 = dma.done.wait (%p1215_p7), [#allocation3], 384   ;;  %p1216_p10 = pmov %p1215_p7 }
  0x62   : > { %s233_s1 = sand.u32 1, %s1022_s28   ;;  %s1108_s10 = sand.u32 1, %s893_s16  }
  0x63   : > { %878 = vsyncadd (%p1216_p10), [#allocation3], 4294966912  ;;  %s675_s30 = smul.u32 192, %s1108_s10  ;;  %s234_s12 = scalar_lea.sflag [#allocation6], %s233_s1 }
  0x64   : > { %p1217_p6 = scmp.ne.s32.totalorder %s1208_s8, 0 }
  0x65   : > { %s1111_s13 = scalar_lea.vmem [#allocation5], %s675_s30 }
  0x66   : > { %880 = dma.done.wait (%p1217_p6), %s234_s12, 3104  }
  0x67   : > { %882 = vsyncadd (%p1217_p6), %s234_s12, 4294964192  ;;  %v911_v0 = vmov 0   ;;  %v296_v1 = vld [vmem:[%s1111_s13 + $0x38] sm:$0xff]  ;;  %v295_v2 = vld [vmem:[%s1111_s13 + $0x30] sm:$0xff]  ;;  %s658_s7 = sshll.u32 %s1022_s28, 1  ;;  %s656_s8 = sshll.u32 %s1108_s10, 1 }
  0x68   : > { %456 = vmatprep.mubr.bf16.mxu1 %v911_v0  ;;  %v326_v3 = vunpack.c.l.s8.bf16 %v296_v1  ;;  %v328_v4 = vunpack.c.h.s8.bf16 %v296_v1  ;;  %v327_v5 = vunpack.c.h.s8.bf16 %v295_v2  ;;  %v294_v6 = vld [vmem:[%s1111_s13 + $0x28] sm:$0xff]  ;;  %v312_v7 = vld [vmem:[%s1111_s13 + $0xb8] sm:$0xff]  ;;  %v311_v8 = vld [vmem:[%s1111_s13 + $0xb0] sm:$0xff]  ;;  %v325_v9 = vunpack.c.l.s8.bf16 %v295_v2  ;;  %p283_p2 = scmp.lt.s32.totalorder %s658_s7, 3  ;;  %s246_s20 = scalar_lea.vmem [#allocation7], %s656_s8 }
  0x69   : > { %v358_v10 = vunpack.c.l.s8.bf16 %v312_v7  ;;  %v360_v11 = vunpack.c.h.s8.bf16 %v312_v7  ;;  %v324_v12 = vunpack.c.h.s8.bf16 %v294_v6  ;;  %v293_v13 = vld [vmem:[%s1111_s13 + $0x20] sm:$0xff]  ;;  %v359_v14 = vunpack.c.h.s8.bf16 %v311_v8  ;;  %v310_v15 = vld [vmem:[%s1111_s13 + $0xa8] sm:$0xff]  ;;  %v292_v21 = vld [vmem:[%s1111_s13 + $0x18] sm:$0xff]  ;;  %s657_s21 = sshll.u32 %s1108_s10, 4  ;;  %s673_s11 = sshll.u32 %s1022_s28, 7 }
  0x6a   : > { %381 = vmatprep.subr.bf16.mxu0 %v328_v4  ;;  %v357_v16 = vunpack.c.l.s8.bf16 %v311_v8  ;;  %v323_v17 = vunpack.c.h.s8.bf16 %v293_v13  ;;  %v356_v18 = vunpack.c.h.s8.bf16 %v310_v15  ;;  %v309_v19 = vld [vmem:[%s1111_s13 + $0xa0] sm:$0xff]  ;;  %v322_v20 = vunpack.c.l.s8.bf16 %v294_v6  ;;  %v750_v22 = vld [vmem:[#allocation2 + $0x4] ss:$12 sps:$4 sm:$0xff]   ;;  %v291_v27 = vld [vmem:[%s1111_s13 + $0x10] sm:$0xff]  ;;  %s1226_s7 = smov (!%p283_p2, %s658_s7), 3  ;;  %s279_s25 = scalar_lea.vmem [#allocation8], %s657_s21 }
  0x6b   : > { %382 = vmatpush1.bf16.msra.mxu0 %v327_v5  ;;  %424 = vmatprep.subr.bf16.mxu1 %v360_v11  ;;  %v355_v23 = vunpack.c.h.s8.bf16 %v309_v19  ;;  %v321_v24 = vunpack.c.l.s8.bf16 %v293_v13  ;;  %v354_v25 = vunpack.c.l.s8.bf16 %v310_v15  ;;  %v320_v26 = vunpack.c.h.s8.bf16 %v292_v21  ;;  %v308_v28 = vld [vmem:[%s1111_s13 + $0x98] sm:$0xff]  ;;  %v307_v32 = vld [vmem:[%s1111_s13 + $0x90] sm:$0xff]  ;;  %v290_v34 = vld [vmem:[%s1111_s13 + $0x8] sm:$0xff]  ;;  %s285_s26 = scalar_lea.vmem %s1199_s3, %s1226_s7  ;;  %s531_s27 = sshll.u32 %s279_s25, 4  ;;  %s1148_s27 = int_to_ptr.vmem [resolvable:$true] %s531_s27 }
  0x6c   : > { %383 = vmatprep.subr.bf16.mxu0 %v326_v3  ;;  %425 = vmatpush1.bf16.msra.mxu1 %v359_v14  ;;  %v353_v29 = vunpack.c.l.s8.bf16 %v309_v19  ;;  %v319_v30 = vunpack.c.h.s8.bf16 %v291_v27  ;;  %v352_v31 = vunpack.c.h.s8.bf16 %v308_v28  ;;  %v318_v33 = vunpack.c.l.s8.bf16 %v292_v21  ;;  %v289_v39 = vld [vmem:[%s1111_s13] sm:$0xff]  ;;  %v306_v40 = vld [vmem:[%s1111_s13 + $0x88] sm:$0xff]  ;;  %v304_v46 = vld [vmem:[%s1111_s13 + $0x78] sm:$0xff]  ;;  %s1153_s5 = scalar_lea.hbm %s1200_s4, %s673_s11  ;;  %s518_s1 = scalar_lea.sflag [#allocation4], %s1108_s10 }
  0x6d   : > { %426 = vmatprep.subr.bf16.mxu1 %v358_v10  ;;  %413 = vmatprep.mubr.bf16.mxu0 %v750_v22  ;;  %v351_v35 = vunpack.c.h.s8.bf16 %v307_v32  ;;  %v317_v36 = vunpack.c.l.s8.bf16 %v291_v27  ;;  %v350_v37 = vunpack.c.l.s8.bf16 %v308_v28  ;;  %v316_v38 = vunpack.c.h.s8.bf16 %v290_v34  ;;  %v305_v44 = vld [vmem:[%s1111_s13 + $0x80] sm:$0xff]  ;;  %v303_v51 = vld [vmem:[%s1111_s13 + $0x70] sm:$0xff]  ;;  %v302_v55 = vld [vmem:[%s1111_s13 + $0x68] sm:$0xff]  ;;  %s833_s30 = scalar_lea.vmem %s1148_s27, 256  ;;  %p1218_p5 = scmp.ne.s32.totalorder %s1209_s29, 0 }
  0x6e   : > { %v349_v41 = vunpack.c.l.s8.bf16 %v307_v32  ;;  %v315_v42 = vunpack.c.h.s8.bf16 %v289_v39  ;;  %v348_v43 = vunpack.c.h.s8.bf16 %v306_v40  ;;  %v314_v45 = vunpack.c.l.s8.bf16 %v290_v34  ;;  %v747_v56 = vld [vmem:[#allocation2 + $0x8] ss:$12 sps:$4 sm:$0xff]   ;;  %v301_v59 = vld [vmem:[%s1111_s13 + $0x60] sm:$0xff]  ;;  %v298_v4 = vld [vmem:[%s1111_s13 + $0x48] sm:$0xff]  ;;  %p834_p4 = scmp.ne.s32.totalorder %s1148_s27, %s833_s30  ;;  %s912_s28 = smov [#allocation8]  }
  0x6f   : > { %384 = vmatpush1.bf16.msra.mxu0 %v325_v9  ;;  %v347_v47 = vunpack.c.h.s8.bf16 %v305_v44  ;;  %v313_v48 = vunpack.c.l.s8.bf16 %v289_v39  ;;  %v346_v49 = vunpack.c.l.s8.bf16 %v306_v40  ;;  %v344_v50 = vunpack.c.h.s8.bf16 %v304_v46  ;;  %v300_v62 = vld [vmem:[%s1111_s13 + $0x58] sm:$0xff]  ;;  %v299_v1 = vld [vmem:[%s1111_s13 + $0x50] sm:$0xff]  ;;  %v297_v7 = vld [vmem:[%s1111_s13 + $0x40] sm:$0xff]  ;;  %s837_s12 = sshll.u32 %s912_s28, 4  ;;  %s838_s12 = int_to_ptr.vmem [resolvable:$false] %s837_s12 }
  0x70   : > { %385 = vmatprep.subr.bf16.mxu0 %v324_v12  ;;  %427 = vmatpush1.bf16.msra.mxu1 %v357_v16  ;;  %v345_v52 = vunpack.c.l.s8.bf16 %v305_v44  ;;  %v343_v53 = vunpack.c.h.s8.bf16 %v303_v51  ;;  %v342_v54 = vunpack.c.l.s8.bf16 %v304_v46  ;;  %v341_v57 = vunpack.c.l.s8.bf16 %v303_v51  ;;  %v748_v11 = vld [vmem:[#allocation2] ss:$12 sps:$4 sm:$0xff]   ;;  %v467_v16 = vld [vmem:[%s246_s20] sm:$0x3]  ;;  %p835_p9 = pnand %p834_p4, %p1218_p5  ;;  %s839_s13 = scalar_lea.vmem %s838_s12, 512 }
  0x71   : > { %428 = vmatprep.subr.bf16.mxu1 %v356_v18  ;;  %v340_v58 = vunpack.c.h.s8.bf16 %v302_v55  ;;  %v339_v60 = vunpack.c.h.s8.bf16 %v301_v59  ;;  %v338_v61 = vunpack.c.l.s8.bf16 %v302_v55  ;;  %v337_v63 = vunpack.c.l.s8.bf16 %v301_v59  ;;  %v483_v19 = vld [vmem:[%s285_s26] sm:$0x3]  ;;  %p840_p11 = scmp.lt.s32.totalorder %s1148_s27, %s838_s12  ;;  %p841_p0 = scmp.lt.s32.totalorder %s839_s13, %s833_s30 }
  0x72   : > { %v336_v0 = vunpack.c.h.s8.bf16 %v300_v62  ;;  %v335_v2 = vunpack.c.h.s8.bf16 %v299_v1  ;;  %v334_v3 = vunpack.c.l.s8.bf16 %v300_v62  ;;  %v333_v5 = vunpack.c.l.s8.bf16 %v299_v1  ;;  %p836_p1 = pneg %p835_p9 }
  0x73   : > { %386 = vmatpush1.bf16.msra.mxu0 %v323_v17  ;;  %v332_v6 = vunpack.c.h.s8.bf16 %v298_v4  ;;  %v331_v8 = vunpack.c.h.s8.bf16 %v297_v7  ;;  %v330_v9 = vunpack.c.l.s8.bf16 %v298_v4  ;;  %v329_v10 = vunpack.c.l.s8.bf16 %v297_v7  ;;  %p842_p3 = por %p841_p0, %p840_p11 }
  0x74   : > { %387 = vmatprep.subr.bf16.mxu0 %v322_v20  ;;  %429 = vmatpush1.bf16.msra.mxu1 %v355_v23  ;;  %v469_v12 = vlaneseq }
  0x75   : > { %430 = vmatprep.subr.bf16.mxu1 %v354_v25  ;;  %p843_p12 = pnand %p842_p3, %p836_p1 }
  0x76   : > { %v470_v13 = vshrl.u32 %v469_v12, 7 }
  0x77   : > { %388 = vmatpush1.bf16.msra.mxu0 %v321_v24 }
  0x78   : > { %389 = vmatprep.subr.bf16.mxu0 %v320_v26  ;;  %431 = vmatpush1.bf16.msra.mxu1 %v353_v29  ;;  %v471_v15 = vsub.s32 0, %v470_v13  ;;  %v475_v17 = vsub.s32 1, %v470_v13 }
  0x79   : > { %432 = vmatprep.subr.bf16.mxu1 %v352_v31 }
  0x7a   : > { %v472_v20 = vrot.slane %v467_v16, %v471_v15  ;;  %v488_v23 = vrot.slane %v483_v19, %v471_v15  ;;  %v476_v24 = vrot.slane %v467_v16, %v475_v17  ;;  %v492_v29 = vrot.slane %v483_v19, %v475_v17 }
  0x7b   : > { %390 = vmatpush1.bf16.msra.mxu0 %v319_v30 }
  0x7c   : > { %391 = vmatprep.subr.bf16.mxu0 %v318_v33  ;;  %433 = vmatpush1.bf16.msra.mxu1 %v351_v35 }
  0x7d   : > { %434 = vmatprep.subr.bf16.mxu1 %v350_v37 }
  0x7f   : > { %392 = vmatpush1.bf16.msra.mxu0 %v317_v36 }
  0x80   : > { %393 = vmatprep.subr.bf16.mxu0 %v316_v38  ;;  %435 = vmatpush1.bf16.msra.mxu1 %v349_v41 }
  0x81   : > { %436 = vmatprep.subr.bf16.mxu1 %v348_v43 }
  0x83   : > { %394 = vmatpush1.bf16.msra.mxu0 %v315_v42 }
  0x84   : > { %395 = vmatprep.subr.bf16.mxu0 %v314_v45  ;;  %437 = vmatpush1.bf16.msra.mxu1 %v347_v47 }
  0x85   : > { %438 = vmatprep.subr.bf16.mxu1 %v346_v49 }
  0x87   : > { %396 = vmatpush1.bf16.msra.mxu0 %v313_v48 }
  0x88   : > { %397 = vmatprep.subr.bf16.mxu0 %v344_v50  ;;  %439 = vmatpush1.bf16.msra.mxu1 %v345_v52 }
  0x8b   : > { %398 = vmatpush2.bf16.msra.mxu0 %v343_v53  ;;  %457 = vmatmul.mubr.bf16.vlgmr.msra.gmra.mxu1 %v747_v56 }
  0x8c   : > { %399 = vmatprep.subr.bf16.mxu0 %v342_v54 }
  0x8f   : > { %400 = vmatpush2.bf16.msra.mxu0 %v341_v57 }
  0x90   : > { %401 = vmatprep.subr.bf16.mxu0 %v340_v58 }
  0x93   : > { %402 = vmatpush2.bf16.msra.mxu0 %v339_v60 }
  0x94   : > { %403 = vmatprep.subr.bf16.mxu0 %v338_v61 }
  0x97   : > { %404 = vmatpush2.bf16.msra.mxu0 %v337_v63 }
  0x98   : > { %405 = vmatprep.subr.bf16.mxu0 %v336_v0 }
  0x9b   : > { %406 = vmatpush2.bf16.msra.mxu0 %v335_v2 }
  0x9c   : > { %407 = vmatprep.subr.bf16.mxu0 %v334_v3 }
  0x9f   : > { %408 = vmatpush2.bf16.msra.mxu0 %v333_v5 }
  0xa0   : > { %409 = vmatprep.subr.bf16.mxu0 %v332_v6 }
  0xa3   : > { %410 = vmatpush2.bf16.msra.mxu0 %v331_v8 }
  0xa4   : > { %411 = vmatprep.subr.bf16.mxu0 %v330_v9 }
  0xa7   : > { %412 = vmatpush2.bf16.msra.mxu0 %v329_v10 }
  0xaa   : > { %414 = vmatmul.mubr.bf16.vlgmr.msra.gmra.mxu0 %v748_v11 }
 0x14b   : > { %v458_v14 = vpop.f32.mrf.mxu1 }
 0x14d   : > { %v460_v18 = vpop.f32.mrf.mxu1 }
 0x14f   : > { %v462_v25 = vpop.f32.mrf.mxu1 }
 0x151   : > { %v464_v34 = vpop.f32.mrf.mxu1 }
 0x16a   : > { %v415_v21 = vpop.f32.mrf.mxu0 }
 0x16b   : > { %v459_v22 = vadd.f32 %v458_v14, %v415_v21 }
 0x16c   : > { %v417_v26 = vpop.f32.mrf.mxu0 }
 0x16d   : > { %v479_v27 = vmul.f32 %v472_v20, %v459_v22  ;;  %v461_v28 = vadd.f32 %v460_v18, %v417_v26 }
 0x16e   : > { %v419_v30 = vpop.f32.mrf.mxu0 }
 0x16f   : > { %v495_v31 = vadd.f32 %v488_v23, %v479_v27  ;;  %v480_v32 = vmul.f32 %v476_v24, %v461_v28  ;;  %v463_v33 = vadd.f32 %v462_v25, %v419_v30 }
 0x170   : > { %v421_v35 = vpop.f32.mrf.mxu0 }
 0x171   : > { %v496_v36 = vadd.f32 %v492_v29, %v480_v32  ;;  %v481_v37 = vmul.f32 %v472_v20, %v463_v33  ;;  %v465_v38 = vadd.f32 %v464_v34, %v421_v35  ;;  %v499_v39 = vmax.f32 %v495_v31, 0.0 }
 0x173   : > { %v500_v40 = vmax.f32 %v496_v36, 0.0  ;;  %v497_v41 = vadd.f32 %v488_v23, %v481_v37  ;;  %v482_v42 = vmul.f32 %v476_v24, %v465_v38 }
 0x175   : > { %v671_v43 = vpack.c.bf16 %v500_v40, %v499_v39  ;;  %v498_v44 = vadd.f32 %v492_v29, %v482_v42  ;;  %v501_v45 = vmax.f32 %v497_v41, 0.0 }
 0x177   : > { %515 = vst [vmem:[%s279_s25] sm:$0xff] %v671_v43  ;;  %v502_v46 = vmax.f32 %v498_v44, 0.0 }
 0x179   : > { %v672_v47 = vpack.c.bf16 %v502_v46, %v501_v45 }
 0x17b   : > { %516 = vst [vmem:[%s279_s25 + $0x8] sm:$0xff] %v672_v47 }
 0x17c   : > { %846 = shalt.err (!%p843_p12)
}
 0x17d   : > { %s847_s7 = scalar_lea.hbm %s1153_s5, 256  ;;  %s851_s23 = scalar_lea.hbm %s1200_s4, 512 }
 0x17e   : > { %p848_p13 = scmp.ne.s32.totalorder %s1153_s5, %s847_s7  ;;  %p852_p10 = scmp.lt.s32.totalorder %s1153_s5, %s1200_s4 }
 0x17f   : > { %p853_p6 = scmp.lt.s32.totalorder %s851_s23, %s847_s7 }
 0x180   : > { %p849_p8 = pnand %p848_p13, %p1218_p5 }
 0x181   : > { %p854_p2 = por %p853_p6, %p852_p10 }
 0x182   : > { %p850_p7 = pneg %p849_p8 }
 0x184   : > { %p855_p4 = pnand %p854_p2, %p850_p7 }
 0x186   : > { %858 = shalt.err (!%p855_p4)
}
 0x187   : > { %s913_s21 = smov 128   ;;  %s914_s25 = smov 256  }
 0x188   : > { %s915_s11 = smov 8  }
 0x189   : > { %684 = dma.vmem_to_hbm [thread:$0]  (%p1218_p5), %s1148_s27, 256, %s1153_s5, %s518_s1, %s913_s21, %s914_s25, %s915_s11  }
 0x18a PF: > { %s546_s14 = sand.u32 1, %s889_s15   ;;  %p1219_p9 = scmp.ne.s32.totalorder %s1210_s6, 0 }
 0x18b   : > { %p1220_p1 = scmp.ge.s32.totalorder %s901_s18, 2  ;;  %s547_s24 = scalar_lea.sflag [#allocation4], %s546_s14 }
 0x18d   : > { %p698_p11 = pnand %p1220_p1, %p1219_p9 }
 0x18f   : > { %p699_p0 = pneg %p698_p11 }
 0x191   : > { %884 = dma.done.wait (%p699_p0), %s547_s24, 256  }
 0x192   : > { %886 = vsyncadd (%p699_p0), %s547_s24, 4294967040  ;;  %p18_p3 = scmp.ge.s32.totalorder %s962_s19, 4   ;;  %s1221_s15 = smov %s893_s16 }
 0x193   : > { %s1222_s16 = smov %s897_s17  ;;  %s1223_s17 = smov %s973_s22 }
 0x194   : > { %s1224_s18 = smov %s962_s19  ;;  %20 = sbr.rel (!%p18_p3) target bundleno = 8 (0x8), region = 100 }
 0x199   :  { %552 = vsyncpa [#allocation3], 1 }
 0x19a   :  { %554 = vsyncpa [#allocation3 + $0x1], 1 }
 0x19b   :  { %555 = vsyncpa [#allocation6], 1 }
 0x19c   :  { %557 = vsyncpa [#allocation6 + $0x1], 1 }
 0x19d   :  { %558 = vsyncpa [#allocation4], 1 }
 0x19e   :  { %560 = vsyncpa [#allocation4 + $0x1], 1 }

</bundles_post_ra>
